<compile_context>
chip_gen: v7x
topology: tpu7x:2x2x1
jax: 0.10.0
libtpu: 0.0.40
codegen_flags: <defaults>
</compile_context>

<pallas_src>
import functools

import jax
import jax.numpy as jnp
from jax import lax
from jax.experimental import pallas as pl
from jax.experimental.pallas import tpu as pltpu

LANE = 128
SUBLANE = 8
DEFAULT_TILE_ROWS = 2048          # (2048,128) f32 = 1 MiB per input block
VMEM_LIMIT_BYTES = 32 * 1024 * 1024


def _round_up(x, m):
    return ((x + m - 1) // m) * m


def _loss_map(p, t, loss_type):
    d = p - t
    if loss_type == "mse":
        return d * d
    return jnp.abs(d)


def _chunk_sum(x):
    # (block_rows, 128) -> (8, 128).  The reshape only splits the sublane axis
    # (layout-compatible with the (8,128) vreg tiling), so this lowers to pure
    # per-vreg VPU adds: no cross-lane reduction, no VMEM temporaries.
    return x.reshape(-1, SUBLANE, LANE).sum(axis=0)


def _make_weighted_kernel(loss_type, block_rows, rows, steps_total):
    """Hot path: accumulate sum(loss*w over valid) and count(valid) per block."""
    rem = rows - (steps_total - 1) * block_rows   # valid rows in the last block
    mask_last = (rem != block_rows)

    def emit(pred_ref, tgt_ref, w_ref, swv_ref, cv_ref, *, masked):
        p = pred_ref[...].astype(jnp.float32)
        t = tgt_ref[...].astype(jnp.float32)
        w = w_ref[...].astype(jnp.float32)
        loss = _loss_map(p, t, loss_type)
        valid = w > 0.0
        if masked:
            # Only the final partial block pays for this (pl.when-gated below).
            ridx = lax.broadcasted_iota(jnp.int32, (block_rows, LANE), 0)
            valid = jnp.logical_and(valid, ridx < rem)
        # where() (not multiply) so garbage rows of a partial block never leak.
        weighted = jnp.where(valid, loss * w, 0.0)
        swv_ref[...] = _chunk_sum(weighted)
        cv_ref[...] = _chunk_sum(valid.astype(jnp.float32))

    def kernel(pred_ref, tgt_ref, w_ref, swv_ref, cv_ref):
        args = (pred_ref, tgt_ref, w_ref, swv_ref, cv_ref)
        if not mask_last:
            emit(*args, masked=False)
        elif steps_total == 1:
            emit(*args, masked=True)
        else:
            is_last = pl.program_id(0) == steps_total - 1

            @pl.when(jnp.logical_not(is_last))
            def _steady():
                emit(*args, masked=False)

            @pl.when(is_last)
            def _tail():
                emit(*args, masked=True)

    return kernel


def _make_mean_kernel(loss_type, block_rows, rows, steps_total):
    """Unweighted path / rare fallback: accumulate sum(loss) per block."""
    rem = rows - (steps_total - 1) * block_rows
    mask_last = (rem != block_rows)

    def emit(pred_ref, tgt_ref, sl_ref, *, masked):
        p = pred_ref[...].astype(jnp.float32)
        t = tgt_ref[...].astype(jnp.float32)
        loss = _loss_map(p, t, loss_type)
        if masked:
            ridx = lax.broadcasted_iota(jnp.int32, (block_rows, LANE), 0)
            loss = jnp.where(ridx < rem, loss, 0.0)
        sl_ref[...] = _chunk_sum(loss)

    def kernel(pred_ref, tgt_ref, sl_ref):
        args = (pred_ref, tgt_ref, sl_ref)
        if not mask_last:
            emit(*args, masked=False)
        elif steps_total == 1:
            emit(*args, masked=True)
        else:
            is_last = pl.program_id(0) == steps_total - 1

            @pl.when(jnp.logical_not(is_last))
            def _steady():
                emit(*args, masked=False)

            @pl.when(is_last)
            def _tail():
                emit(*args, masked=True)

    return kernel


def _run(kernel, inputs, block_rows, steps_total, n_out):
    """Stream (rows,128) slabs through the kernel; per-step (8,128) partials."""
    in_spec = pl.BlockSpec((block_rows, LANE), lambda i: (i, 0))
    out_spec = pl.BlockSpec((SUBLANE, LANE), lambda i: (i, 0))
    out_sh = jax.ShapeDtypeStruct((steps_total * SUBLANE, LANE), jnp.float32)
    # NOTE: with <=1024-row blocks one could also pass
    # pipeline_mode=pl.Buffered(3) on the input specs; at the default 2048-row
    # blocks double buffering already hides the DMA.
    return pl.pallas_call(
        kernel,
        grid=(steps_total,),
        in_specs=[in_spec] * len(inputs),
        out_specs=[out_spec] * n_out,
        out_shape=[out_sh] * n_out,
        compiler_params=pltpu.CompilerParams(
            # Each step writes its own output block => no accumulator revisit,
            # axis is truly parallel (megacore-shardable, serial loop on 1-TC).
            # TODO(synk): on v7x verify this shards across both TensorCores;
            # otherwise switch to pltpu.CORE_PARALLEL for this axis.
            dimension_semantics=("parallel",),
            vmem_limit_bytes=VMEM_LIMIT_BYTES,
        ),
    )(*inputs)


@functools.partial(
    jax.jit, static_argnames=("loss_type", "use_tid_weights", "max_tile_rows"))
def tid_weighted_loss(
    pred,
    target,
    tid_weights=None,
    *,
    loss_type="mse",
    use_tid_weights=True,
    tid_weight_scale=1.0,
    max_tile_rows=DEFAULT_TILE_ROWS,
):
    """Forward pass of TIDWeightedLoss. Returns a float32 scalar."""
    if loss_type not in ("mse", "mae"):
        raise ValueError(f"unsupported loss_type: {loss_type}")

    n = pred.size
    rows = -(-n // LANE)            # ceil(n / 128)
    pad = rows * LANE - n           # < 128; nonzero only when n % 128 != 0

    def prep(x):
        flat = jnp.reshape(x, (-1,))
        if pad:
            # Rare path (n % 128 != 0): pad <128 zeros so the lane-dense view
            # exists; zeros contribute nothing to any partial sum.  When
            # n % 128 == 0 this is a copy-free reshape (no HBM traffic).
            flat = jnp.pad(flat, (0, pad))
        return flat.reshape(rows, LANE)

    tile_rows = max(SUBLANE, (int(max_tile_rows) // SUBLANE) * SUBLANE)
    block_rows = min(tile_rows, _round_up(rows, SUBLANE))   # multiple of 8
    steps_total = -(-rows // block_rows)

    pred2 = prep(pred)
    tgt2 = prep(target)

    def mean_loss():
        kernel = _make_mean_kernel(loss_type, block_rows, rows, steps_total)
        (sl,) = _run(kernel, (pred2, tgt2), block_rows, steps_total, 1)
        return jnp.sum(sl) / jnp.float32(n)

    use_w = bool(use_tid_weights) and (tid_weights is not None)
    if not use_w:
        return mean_loss()

    w2 = prep(tid_weights)
    kernel = _make_weighted_kernel(loss_type, block_rows, rows, steps_total)
    swv, cv = _run(kernel, (pred2, tgt2, w2), block_rows, steps_total, 2)

    sum_wv = jnp.sum(swv)
    count = jnp.sum(cv.astype(jnp.int32))            # exact integer count
    scale = jnp.asarray(tid_weight_scale, jnp.float32)

    def weighted_branch(_):
        return scale * sum_wv / jnp.maximum(count, 1).astype(jnp.float32)

    def fallback_branch(_):
        # Rare: no positive weights anywhere -> plain mean(loss).  The second
        # (unweighted) pass only executes when this branch is actually taken.
        return mean_loss()

    return lax.cond(count > 0, weighted_branch, fallback_branch, None)


def _reference(pred, target, tid_weights, loss_type, use_tid_weights, scale):
    p = pred.astype(jnp.float32)
    t = target.astype(jnp.float32)
    lm = (p - t) ** 2 if loss_type == "mse" else jnp.abs(p - t)
    if use_tid_weights and tid_weights is not None:
        w = tid_weights.astype(jnp.float32)
        valid = w > 0
        cnt = jnp.sum(valid)
        wsum = jnp.sum(jnp.where(valid, lm * (w * scale), 0.0))
        return jnp.where(cnt > 0, wsum / jnp.maximum(cnt, 1), jnp.mean(lm))
    return jnp.mean(lm)


if __name__ == "__main__":
    key = jax.random.PRNGKey(0)
    k1, k2, k3, k4, k5, k6 = jax.random.split(key, 6)

    def check(out, ref, name):
        out = jax.block_until_ready(out)
        assert jnp.allclose(out, ref, rtol=1e-5, atol=1e-5), (name, out, ref)

    B, C, H, W = 2, 4, 16, 16
    pred = jax.random.normal(k1, (B, C, H, W), jnp.float32)
    target = jax.random.normal(k2, (B, C, H, W), jnp.float32)
    tid_weights = jax.random.uniform(k3, (B, C, H, W), jnp.float32) - 0.3
    scale = 1.5

    # 1) Weighted MSE (single full block, no mask code emitted).
    check(tid_weighted_loss(pred, target, tid_weights, loss_type="mse",
                            tid_weight_scale=scale),
          _reference(pred, target, tid_weights, "mse", True, scale),
          "weighted_mse")

    # 2) Unweighted MAE (tid_weights=None -> dedicated mean kernel).
    check(tid_weighted_loss(pred, target, None, loss_type="mae",
                            tid_weight_scale=scale),
          _reference(pred, target, None, "mae", True, scale),
          "unweighted_mae")

    # 3) No positive weights -> lax.cond fallback (second, unweighted pass).
    neg_w = -jnp.abs(tid_weights) - 0.1
    check(tid_weighted_loss(pred, target, neg_w, loss_type="mse",
                            tid_weight_scale=scale),
          _reference(pred, target, neg_w, "mse", True, scale),
          "fallback_mean")

    # 4) n % 1024 != 0 (rows = 17): copy-free reshape (no pad), multi-step grid
    #    with a pl.when-gated masked final partial block.
    B2, C2, H2, W2 = 2, 4, 16, 17
    pred_b = jax.random.normal(k4, (B2, C2, H2, W2), jnp.float32)
    target_b = jax.random.normal(k5, (B2, C2, H2, W2), jnp.float32)
    tidw_b = jax.random.uniform(k6, (B2, C2, H2, W2), jnp.float32) - 0.3
    check(tid_weighted_loss(pred_b, target_b, tidw_b, loss_type="mae",
                            tid_weight_scale=scale, max_tile_rows=8),
          _reference(pred_b, target_b, tidw_b, "mae", True, scale),
          "masked_weighted_mae")

    # 5) Same shape, use_tid_weights=False, single masked partial block.
    check(tid_weighted_loss(pred_b, target_b, None, loss_type="mse",
                            use_tid_weights=False, tid_weight_scale=scale),
          _reference(pred_b, target_b, None, "mse", False, scale),
          "masked_mean_mse")

    # 6) bf16 inputs streamed natively, f32 math in-kernel.
    pred_h = pred.astype(jnp.bfloat16)
    target_h = target.astype(jnp.bfloat16)
    check(tid_weighted_loss(pred_h, target_h, tid_weights, loss_type="mse",
                            tid_weight_scale=scale),
          _reference(pred_h, target_h, tid_weights, "mse", True, scale),
          "bf16_weighted_mse")

    print("KERNEL_OK")
</pallas_src>

<mosaic_0001>
module attributes {stable_mosaic.version = 11 : i64} {
  func.func @kernel(%arg0: i32, %arg1: memref<16x128xf32, #tpu.memory_space<vmem>>, %arg2: memref<16x128xf32, #tpu.memory_space<vmem>>, %arg3: memref<16x128xf32, #tpu.memory_space<vmem>>, %arg4: memref<8x128xf32, #tpu.memory_space<vmem>>, %arg5: memref<8x128xf32, #tpu.memory_space<vmem>>) attributes {dimension_semantics = [#tpu.dimension_semantics<parallel>], iteration_bounds = array<i64: 1>, scalar_prefetch = 0 : i64, scratch_operands = 0 : i64, tpu.core_type = #tpu.core_type<tc>, window_params = [{transform_indices = @transform_0, window_bounds = array<i64: 16, 128>}, {transform_indices = @transform_1, window_bounds = array<i64: 16, 128>}, {transform_indices = @transform_2, window_bounds = array<i64: 16, 128>}, {transform_indices = @transform_3, window_bounds = array<i64: 8, 128>}, {transform_indices = @transform_4, window_bounds = array<i64: 8, 128>}]} {
    %c0 = arith.constant 0 : index
    %c0_0 = arith.constant 0 : index
    %0 = vector.load %arg1[%c0, %c0_0] : memref<16x128xf32, #tpu.memory_space<vmem>>, vector<16x128xf32>
    %c0_1 = arith.constant 0 : index
    %c0_2 = arith.constant 0 : index
    %1 = vector.load %arg2[%c0_1, %c0_2] : memref<16x128xf32, #tpu.memory_space<vmem>>, vector<16x128xf32>
    %c0_3 = arith.constant 0 : index
    %c0_4 = arith.constant 0 : index
    %2 = vector.load %arg3[%c0_3, %c0_4] : memref<16x128xf32, #tpu.memory_space<vmem>>, vector<16x128xf32>
    %3 = arith.subf %0, %1 : vector<16x128xf32>
    %4 = arith.mulf %3, %3 : vector<16x128xf32>
    %cst = arith.constant 0.000000e+00 : f32
    %5 = vector.broadcast %cst : f32 to vector<16x128xf32>
    %6 = arith.cmpf ogt, %2, %5 : vector<16x128xf32>
    %7 = arith.mulf %4, %2 : vector<16x128xf32>
    %cst_5 = arith.constant 0.000000e+00 : f32
    %8 = vector.broadcast %cst_5 : f32 to vector<16x128xf32>
    %9 = arith.select %6, %7, %8 : vector<16x128xi1>, vector<16x128xf32>
    %10 = vector.shape_cast %9 : vector<16x128xf32> to vector<2x8x128xf32>
    %cst_6 = arith.constant dense<0.000000e+00> : vector<8x128xf32>
    %11 = vector.multi_reduction <add>, %10, %cst_6 [0] : vector<2x8x128xf32> to vector<8x128xf32>
    %c0_7 = arith.constant 0 : index
    %c0_8 = arith.constant 0 : index
    %12 = vector.load %arg4[%c0_7, %c0_8] : memref<8x128xf32, #tpu.memory_space<vmem>>, vector<8x128xf32>
    tpu.vector_store %arg4[%c0_7, %c0_8], %11 {strides = array<i32>} : memref<8x128xf32, #tpu.memory_space<vmem>>, vector<8x128xf32>,
    %13 = arith.extui %6 : vector<16x128xi1> to vector<16x128xi32>
    %14 = arith.sitofp %13 : vector<16x128xi32> to vector<16x128xf32>
    %15 = vector.shape_cast %14 : vector<16x128xf32> to vector<2x8x128xf32>
    %cst_9 = arith.constant dense<0.000000e+00> : vector<8x128xf32>
    %16 = vector.multi_reduction <add>, %15, %cst_9 [0] : vector<2x8x128xf32> to vector<8x128xf32>
    %c0_10 = arith.constant 0 : index
    %c0_11 = arith.constant 0 : index
    %17 = vector.load %arg5[%c0_10, %c0_11] : memref<8x128xf32, #tpu.memory_space<vmem>>, vector<8x128xf32>
    tpu.vector_store %arg5[%c0_10, %c0_11], %16 {strides = array<i32>} : memref<8x128xf32, #tpu.memory_space<vmem>>, vector<8x128xf32>,
    return
  }
  func.func @transform_0(%arg0: i32) -> (i32, i32) {
    %c0_i32 = arith.constant 0 : i32
    %c0_i32_0 = arith.constant 0 : i32
    return %arg0, %c0_i32 : i32, i32
  }
  func.func @transform_1(%arg0: i32) -> (i32, i32) {
    %c0_i32 = arith.constant 0 : i32
    %c0_i32_0 = arith.constant 0 : i32
    return %arg0, %c0_i32 : i32, i32
  }
  func.func @transform_2(%arg0: i32) -> (i32, i32) {
    %c0_i32 = arith.constant 0 : i32
    %c0_i32_0 = arith.constant 0 : i32
    return %arg0, %c0_i32 : i32, i32
  }
  func.func @transform_3(%arg0: i32) -> (i32, i32) {
    %c0_i32 = arith.constant 0 : i32
    %c0_i32_0 = arith.constant 0 : i32
    return %arg0, %c0_i32 : i32, i32
  }
  func.func @transform_4(%arg0: i32) -> (i32, i32) {
    %c0_i32 = arith.constant 0 : i32
    %c0_i32_0 = arith.constant 0 : i32
    return %arg0, %c0_i32 : i32, i32
  }
}

module attributes {stable_mosaic.version = 11 : i64} {
  func.func @kernel(%arg0: i32, %arg1: memref<16x128xf32, #tpu.memory_space<vmem>>, %arg2: memref<16x128xf32, #tpu.memory_space<vmem>>, %arg3: memref<8x128xf32, #tpu.memory_space<vmem>>) attributes {dimension_semantics = [#tpu.dimension_semantics<parallel>], iteration_bounds = array<i64: 1>, scalar_prefetch = 0 : i64, scratch_operands = 0 : i64, tpu.core_type = #tpu.core_type<tc>, window_params = [{transform_indices = @transform_0, window_bounds = array<i64: 16, 128>}, {transform_indices = @transform_1, window_bounds = array<i64: 16, 128>}, {transform_indices = @transform_2, window_bounds = array<i64: 8, 128>}]} {
    %c0 = arith.constant 0 : index
    %c0_0 = arith.constant 0 : index
    %0 = vector.load %arg1[%c0, %c0_0] : memref<16x128xf32, #tpu.memory_space<vmem>>, vector<16x128xf32>
    %c0_1 = arith.constant 0 : index
    %c0_2 = arith.constant 0 : index
    %1 = vector.load %arg2[%c0_1, %c0_2] : memref<16x128xf32, #tpu.memory_space<vmem>>, vector<16x128xf32>
    %2 = arith.subf %0, %1 : vector<16x128xf32>
    %3 = arith.mulf %2, %2 : vector<16x128xf32>
    %4 = vector.shape_cast %3 : vector<16x128xf32> to vector<2x8x128xf32>
    %cst = arith.constant dense<0.000000e+00> : vector<8x128xf32>
    %5 = vector.multi_reduction <add>, %4, %cst [0] : vector<2x8x128xf32> to vector<8x128xf32>
    %c0_3 = arith.constant 0 : index
    %c0_4 = arith.constant 0 : index
    %6 = vector.load %arg3[%c0_3, %c0_4] : memref<8x128xf32, #tpu.memory_space<vmem>>, vector<8x128xf32>
    tpu.vector_store %arg3[%c0_3, %c0_4], %5 {strides = array<i32>} : memref<8x128xf32, #tpu.memory_space<vmem>>, vector<8x128xf32>,
    return
  }
  func.func @transform_0(%arg0: i32) -> (i32, i32) {
    %c0_i32 = arith.constant 0 : i32
    %c0_i32_0 = arith.constant 0 : i32
    return %arg0, %c0_i32 : i32, i32
  }
  func.func @transform_1(%arg0: i32) -> (i32, i32) {
    %c0_i32 = arith.constant 0 : i32
    %c0_i32_0 = arith.constant 0 : i32
    return %arg0, %c0_i32 : i32, i32
  }
  func.func @transform_2(%arg0: i32) -> (i32, i32) {
    %c0_i32 = arith.constant 0 : i32
    %c0_i32_0 = arith.constant 0 : i32
    return %arg0, %c0_i32 : i32, i32
  }
}

</mosaic_0001>

<bundles_post_ra>
// kernel: branch_0_fun.1
= control target key start
LH: loop header
LB: loop body
LE: loop exit
PB: predicated region body
PF: predicated region fallthrough
CT: control target
= control target key end

     0   :  { %s55_s0 = inlined_call_operand.vmem [shape: f32[16,128], index: 0, kind: input, shape index: {}]   ;;  %s56_s1 = inlined_call_operand.vmem [shape: f32[16,128], index: 1, kind: input, shape index: {}]   ;;  %s57_s2 = inlined_call_operand.vmem [shape: f32[8,128], index: 2, kind: output, shape index: {}]  }
   0x1   :  { %v11_v0 = vld [vmem:[%s55_s0] sm:$0xff]  ;;  %v12_v1 = vld [vmem:[%s55_s0 + $0x8] sm:$0xff] }
   0x2   :  { %v13_v2 = vld [vmem:[%s56_s1] sm:$0xff]  ;;  %v14_v3 = vld [vmem:[%s56_s1 + $0x8] sm:$0xff] }
   0x3   :  { %v15_v4 = vsub.f32 %v11_v0, %v13_v2  ;;  %v16_v5 = vsub.f32 %v12_v1, %v14_v3 }
   0x5   :  { %v17_v6 = vmul.f32 %v15_v4, %v15_v4  ;;  %v18_v7 = vmul.f32 %v16_v5, %v16_v5 }
   0x7   :  { %v19_v8 = vadd.f32 %v18_v7, %v17_v6 }
   0x9   :  { %20 = vst [vmem:[%s57_s2] sm:$0xff] %v19_v8 }

// kernel: tid_weighted_loss.1
= control target key start
LH: loop header
LB: loop body
LE: loop exit
PB: predicated region body
PF: predicated region fallthrough
CT: control target
= control target key end

     0   :  { %v51_v9 = vmov 0.0   ;;  %s101_s0 = inlined_call_operand.vmem [shape: f32[16,128], index: 0, kind: input, shape index: {}]   ;;  %s102_s1 = inlined_call_operand.vmem [shape: f32[16,128], index: 1, kind: input, shape index: {}]   ;;  %s103_s2 = inlined_call_operand.vmem [shape: f32[16,128], index: 2, kind: input, shape index: {}]   ;;  %s104_s4 = inlined_call_operand.vmem [shape: f32[8,128], index: 4, kind: output, shape index: {1}]   ;;  %s105_s3 = inlined_call_operand.vmem [shape: f32[8,128], index: 3, kind: output, shape index: {0}]  }
   0x1   :  { %v16_v0 = vld [vmem:[%s101_s0] sm:$0xff]  ;;  %v17_v1 = vld [vmem:[%s101_s0 + $0x8] sm:$0xff] }
   0x2   :  { %v18_v2 = vld [vmem:[%s102_s1] sm:$0xff]  ;;  %v19_v3 = vld [vmem:[%s102_s1 + $0x8] sm:$0xff] }
   0x3   :  { %v20_v4 = vld [vmem:[%s103_s2] sm:$0xff]  ;;  %v21_v5 = vld [vmem:[%s103_s2 + $0x8] sm:$0xff]  ;;  %v22_v6 = vsub.f32 %v16_v0, %v18_v2  ;;  %v23_v7 = vsub.f32 %v17_v1, %v19_v3 }
   0x4   :  { %vm26_vm0 = vcmp.gt.f32.partialorder %v20_v4, 0.0  ;;  %vm27_vm1 = vcmp.gt.f32.partialorder %v21_v5, 0.0 }
   0x5   :  { %v24_v8 = vmul.f32 %v22_v6, %v22_v6  ;;  %v48_v10 = vsel %vm26_vm0, 1.0, %v51_v9  ;;  %v49_v11 = vsel %vm27_vm1, 1.0, %v51_v9  ;;  %v25_v12 = vmul.f32 %v23_v7, %v23_v7 }
   0x6   :  { %v38_v13 = vadd.f32 %v49_v11, %v48_v10 }
   0x7   :  { %v28_v14 = vmul.f32 %v24_v8, %v20_v4  ;;  %v29_v15 = vmul.f32 %v25_v12, %v21_v5 }
   0x8   :  { %39 = vst [vmem:[%s104_s4] sm:$0xff] %v38_v13 }
   0x9   :  { %v30_v16 = vsel %vm26_vm0, %v28_v14, 0.0  ;;  %v31_v17 = vsel %vm27_vm1, %v29_v15, 0.0 }
   0xa   :  { %v32_v18 = vadd.f32 %v31_v17, %v30_v16 }
   0xc   :  { %33 = vst [vmem:[%s105_s3] sm:$0xff] %v32_v18 }

</bundles_post_ra>
